<compile_context>
chip_gen: v7x
topology: tpu7x:2x2x1
jax: 0.10.0
libtpu: 0.0.40
codegen_flags: <defaults>
</compile_context>

<pallas_src>
import math
from functools import partial

import jax
import jax.numpy as jnp
from jax.experimental import pallas as pl
from jax.experimental.pallas import tpu as pltpu

# ----------------------------- config -----------------------------
D_MODEL = 128          # cfg.fusion_xformer.d_model (small test value)
NHEAD = 8              # cfg.fusion_xformer.nhead
NUM_LAYERS = 3         # cfg.fusion_xformer.num_layers
DIM_FF = 2048          # nn.TransformerEncoderLayer default dim_feedforward
TEXT_DIM = 512         # TEXT_ENCODER_DIMS['t5-small']
C_ENC = 64             # image_encoder.cfg.output_size[0] (synthetic backbone)
PATCH = 8              # synthetic backbone patch size
EPS = 1e-5             # nn.LayerNorm / layer_norm_eps default

VMEM_LIMIT = 64 * 1024 * 1024   # above the 32 MiB scoped default, <= v7x physical


def _round_up(x, m):
    return (x + m - 1) // m * m


def _largest_divisor_leq(n, cap):
    for d in range(min(n, cap), 0, -1):
        if n % d == 0:
            return d
    return 1


def _layernorm(x, g, b):
    mu = jnp.mean(x, axis=-1, keepdims=True)
    var = jnp.mean(jnp.square(x - mu), axis=-1, keepdims=True)
    return (x - mu) * jax.lax.rsqrt(var + EPS) * g + b


def _full_spec(a):
    nd = a.ndim
    return pl.BlockSpec(a.shape, lambda *_: (0,) * nd)


# ----------------------- visual pipeline kernel -----------------------
# fused patch-embed+conv1 (1x1) -> ReLU -> conv2 (1x1) -> ReLU
#   -> visual_adapter (Linear -> LayerNorm -> ReLU) -> + camera token
def visual_pipeline_kernel(x_ref, w1_ref, b1_ref, w2_ref, b2_ref,
                           wv_ref, bv_ref, g_ref, be_ref, cam_ref, o_ref):
    x = x_ref[0].astype(jnp.bfloat16)                                  # (br, PD)
    # patch-embed folded into compressor conv1 (1x1): single matmul + ReLU
    h = jnp.dot(x, w1_ref[...], preferred_element_type=jnp.float32) + b1_ref[...]
    h = jnp.maximum(h, 0.0)
    # compressor conv2 (1x1) + ReLU
    h = jnp.dot(h.astype(jnp.bfloat16), w2_ref[...],
                preferred_element_type=jnp.float32) + b2_ref[...]
    h = jnp.maximum(h, 0.0)
    # visual_adapter: Linear -> LayerNorm -> ReLU
    a = jnp.dot(h.astype(jnp.bfloat16), wv_ref[...],
                preferred_element_type=jnp.float32) + bv_ref[...]
    a = jnp.maximum(_layernorm(a, g_ref[...], be_ref[...]), 0.0)
    # per-camera token add fused in (grid axis 0 = sensor)
    o_ref[0] = a + cam_ref[0]


def run_visual_pipeline(patches, cam_tokens, p, block_rows=512):
    n_s, R, PD = patches.shape
    br = min(block_rows, _round_up(R, 8))
    Rpad = _round_up(R, br)
    if Rpad != R:
        patches = jnp.pad(patches, ((0, 0), (0, Rpad - R), (0, 0)))
    args = (p['w_vc1'], p['b_vc1'], p['w_vc2'], p['b_vc2'],
            p['w_va'], p['b_va'], p['g_va'], p['be_va'])
    out = pl.pallas_call(
        visual_pipeline_kernel,
        out_shape=jax.ShapeDtypeStruct((n_s, Rpad, D_MODEL), jnp.float32),
        grid=(n_s, Rpad // br),
        in_specs=[pl.BlockSpec((1, br, PD), lambda s, i: (s, i, 0))]
                 + [_full_spec(a) for a in args]
                 + [pl.BlockSpec((1, 1, D_MODEL), lambda s, i: (s, 0, 0))],
        out_specs=pl.BlockSpec((1, br, D_MODEL), lambda s, i: (s, i, 0)),
        compiler_params=pltpu.CompilerParams(
            dimension_semantics=("parallel", "parallel"),
            vmem_limit_bytes=VMEM_LIMIT),
    )(patches, *args, cam_tokens)
    return out[:, :R, :]


# --------------------------- text adapter kernel ---------------------------
# text_adapter: Linear -> LayerNorm -> ReLU  (row-wise over B*L tokens)
def adapter_kernel(x_ref, w_ref, b_ref, g_ref, be_ref, o_ref):
    a = jnp.dot(x_ref[...].astype(jnp.bfloat16), w_ref[...],
                preferred_element_type=jnp.float32) + b_ref[...]
    o_ref[...] = jnp.maximum(_layernorm(a, g_ref[...], be_ref[...]), 0.0)


def run_adapter(x, w, b, g, be, block_rows=512):
    N, din = x.shape
    br = min(block_rows, _round_up(N, 8))
    Npad = _round_up(N, br)
    if Npad != N:
        x = jnp.pad(x, ((0, Npad - N), (0, 0)))
    dout = w.shape[1]
    out = pl.pallas_call(
        adapter_kernel,
        out_shape=jax.ShapeDtypeStruct((Npad, dout), jnp.float32),
        grid=(Npad // br,),
        in_specs=[pl.BlockSpec((br, din), lambda i: (i, 0)),
                  _full_spec(w), _full_spec(b), _full_spec(g), _full_spec(be)],
        out_specs=pl.BlockSpec((br, dout), lambda i: (i, 0)),
        compiler_params=pltpu.CompilerParams(
            dimension_semantics=("parallel",), vmem_limit_bytes=VMEM_LIMIT),
    )(x, w, b, g, be)
    return out[:N]


# ---------------------- fused fusion transformer ----------------------
# All NUM_LAYERS post-norm nn.TransformerEncoderLayer blocks in one kernel:
#   x = LN1(x + MHA(x)); x = LN2(x + FFN(x))   (dropout == identity in eval)
# Weights are stacked along a leading (NUM_LAYERS, ...) axis and stay in VMEM.
def fusion_xformer_kernel(x_ref, wqkv_ref, bqkv_ref, wo_ref, bo_ref,
                          w1_ref, b1_ref, w2_ref, b2_ref,
                          g1_ref, be1_ref, g2_ref, be2_ref,
                          o_ref, ctx_ref, *, nhead, s_valid):
    Bblk, Spad, D = x_ref.shape
    hd = D // nhead
    scale = 1.0 / math.sqrt(hd)
    M = Bblk * Spad

    # additive key-padding mask: padded key positions -> -1e30 before softmax
    key_bias = jnp.where(
        jax.lax.broadcasted_iota(jnp.int32, (1, 1, Spad), 2) < s_valid,
        0.0, -1e30).astype(jnp.float32)

    x = x_ref[...].reshape(M, D)                                       # f32

    for l in range(NUM_LAYERS):
        xb = x.astype(jnp.bfloat16)
        qkv = jnp.dot(xb, wqkv_ref[l],
                      preferred_element_type=jnp.float32) + bqkv_ref[l]
        q = qkv[:, :D]
        k = qkv[:, D:2 * D]
        v = qkv[:, 2 * D:]

        # batched-over-sequences attention; per-head contexts go straight into
        # a VMEM scratch slice (no concatenate).
        for h in range(nhead):
            sl = slice(h * hd, (h + 1) * hd)
            qh = q[:, sl].reshape(Bblk, Spad, hd).astype(jnp.bfloat16)
            kh = k[:, sl].reshape(Bblk, Spad, hd).astype(jnp.bfloat16)
            vh = v[:, sl].reshape(Bblk, Spad, hd).astype(jnp.bfloat16)
            s = jnp.einsum('bqd,bkd->bqk', qh, kh,
                           preferred_element_type=jnp.float32) * scale
            s = s + key_bias
            s = s - jnp.max(s, axis=-1, keepdims=True)
            p = jnp.exp(s)
            inv = pl.reciprocal(jnp.sum(p, axis=-1, keepdims=True), approx=True)
            ctx_h = jnp.einsum('bqk,bkd->bqd', p.astype(jnp.bfloat16), vh,
                               preferred_element_type=jnp.float32) * inv
            ctx_ref[:, sl] = ctx_h.reshape(M, hd)

        ctx = ctx_ref[...].astype(jnp.bfloat16)
        attn = jnp.dot(ctx, wo_ref[l],
                       preferred_element_type=jnp.float32) + bo_ref[l]
        h1 = _layernorm(x + attn, g1_ref[l], be1_ref[l])

        ff = jnp.dot(h1.astype(jnp.bfloat16), w1_ref[l],
                     preferred_element_type=jnp.float32) + b1_ref[l]
        ff = jnp.maximum(ff, 0.0)
        ff = jnp.dot(ff.astype(jnp.bfloat16), w2_ref[l],
                     preferred_element_type=jnp.float32) + b2_ref[l]
        x = _layernorm(h1 + ff, g2_ref[l], be2_ref[l])

    o_ref[...] = x.reshape(Bblk, Spad, D)


def run_fusion_xformer(x, xf, s_valid, bblk_target=8):
    BT, Spad, D = x.shape
    Bblk = _largest_divisor_leq(BT, bblk_target)
    args = (xf['wqkv'], xf['bqkv'], xf['wo'], xf['bo'],
            xf['w1'], xf['b1'], xf['w2'], xf['b2'],
            xf['g1'], xf['be1'], xf['g2'], xf['be2'])
    return pl.pallas_call(
        partial(fusion_xformer_kernel, nhead=NHEAD, s_valid=s_valid),
        out_shape=jax.ShapeDtypeStruct((BT, Spad, D), jnp.float32),
        grid=(BT // Bblk,),
        in_specs=[pl.BlockSpec((Bblk, Spad, D), lambda i: (i, 0, 0))]
                 + [_full_spec(a) for a in args],
        out_specs=pl.BlockSpec((Bblk, Spad, D), lambda i: (i, 0, 0)),
        scratch_shapes=[pltpu.VMEM((Bblk * Spad, D), jnp.float32)],
        compiler_params=pltpu.CompilerParams(
            dimension_semantics=("parallel",), vmem_limit_bytes=VMEM_LIMIT),
    )(x, *args)


# ------------------------------- params -------------------------------
def init_params(key, sensors):
    ks = iter(jax.random.split(key, 64))

    def lin(din, dout):
        return jax.random.normal(next(ks), (din, dout), jnp.float32) * (1.0 / math.sqrt(din))

    def bias(dout):
        return jax.random.normal(next(ks), (1, dout), jnp.float32) * 0.02

    p = {}
    PD = 3 * PATCH * PATCH
    # TODO(synk): linear patch-embed stand-in for the pretrained DINOv2 backbone.
    wp, bp = lin(PD, C_ENC), bias(C_ENC)
    wc1, bc1 = lin(C_ENC, D_MODEL), bias(D_MODEL)
    # Fold patch-embed into compressor conv1 offline (no nonlinearity between):
    p['w_vc1'] = (wp @ wc1).astype(jnp.bfloat16)
    p['b_vc1'] = bp @ wc1 + bc1
    p['w_vc2'] = lin(D_MODEL, D_MODEL).astype(jnp.bfloat16)   # compressor conv2 (1x1)
    p['b_vc2'] = bias(D_MODEL)
    p['w_va'] = lin(D_MODEL, D_MODEL).astype(jnp.bfloat16)    # visual_adapter Linear
    p['b_va'] = bias(D_MODEL)
    p['g_va'], p['be_va'] = jnp.ones((1, D_MODEL)), jnp.zeros((1, D_MODEL))

    p['w_t'] = lin(TEXT_DIM, D_MODEL).astype(jnp.bfloat16)    # text_adapter Linear
    p['b_t'] = bias(D_MODEL)
    p['g_t'], p['be_t'] = jnp.ones((1, D_MODEL)), jnp.zeros((1, D_MODEL))

    p['fusion_token'] = 0.1 * jax.random.uniform(next(ks), (D_MODEL,), jnp.float32)
    # camera tokens stacked in sorted(sensor) order: (n_sensors, 1, D)
    p['camera_tokens'] = jnp.stack(
        [0.1 * jax.random.uniform(next(ks), (D_MODEL,), jnp.float32) for _ in sensors]
    )[:, None, :]

    def stack(fn):
        return jnp.stack([fn() for _ in range(NUM_LAYERS)])

    p['xf'] = {
        'wqkv': stack(lambda: lin(D_MODEL, 3 * D_MODEL)).astype(jnp.bfloat16),
        'bqkv': stack(lambda: bias(3 * D_MODEL)),
        'wo':   stack(lambda: lin(D_MODEL, D_MODEL)).astype(jnp.bfloat16),
        'bo':   stack(lambda: bias(D_MODEL)),
        'w1':   stack(lambda: lin(D_MODEL, DIM_FF)).astype(jnp.bfloat16),
        'b1':   stack(lambda: bias(DIM_FF)),
        'w2':   stack(lambda: lin(DIM_FF, D_MODEL)).astype(jnp.bfloat16),
        'b2':   stack(lambda: bias(D_MODEL)),
        'g1':   jnp.ones((NUM_LAYERS, 1, D_MODEL)),
        'be1':  jnp.zeros((NUM_LAYERS, 1, D_MODEL)),
        'g2':   jnp.ones((NUM_LAYERS, 1, D_MODEL)),
        'be2':  jnp.zeros((NUM_LAYERS, 1, D_MODEL)),
    }
    return p


# ------------------------------- forward -------------------------------
def forward(frames, text_encoder_feats, params):
    sensors = sorted(frames.keys())
    B, T, C, H, W = frames[sensors[0]].shape
    for s in sensors:
        assert frames[s].shape[2:] == (C, H, W)
    BT = B * T
    Ph, Pw = H // PATCH, W // PATCH
    P = Ph * Pw
    n_s = len(sensors)

    # encode_imgs: patchify (layout glue), then backbone+compressor+adapter
    # + camera-token add all inside one Pallas kernel.
    patch_list = []
    for s in sensors:
        imgs = frames[s].reshape(BT, C, H, W)
        pat = imgs.reshape(BT, C, Ph, PATCH, Pw, PATCH).transpose(0, 2, 4, 1, 3, 5)
        patch_list.append(pat.reshape(BT * P, C * PATCH * PATCH))
    patches = jnp.stack(patch_list, axis=0)                    # (n_s, BT*P, PD)

    vis = run_visual_pipeline(patches, params['camera_tokens'], params)
    concatenated = vis.reshape(n_s, BT, P, D_MODEL).transpose(1, 0, 2, 3) \
                      .reshape(BT, n_s * P, D_MODEL)           # (BT, n_s*P, D)

    # encode_text: frozen encoder output -> text_adapter (Pallas)
    Btxt, L, TD = text_encoder_feats.shape
    txt = run_adapter(text_encoder_feats.reshape(Btxt * L, TD),
                      params['w_t'], params['b_t'], params['g_t'], params['be_t'])
    text_feats = txt.reshape(Btxt, L, D_MODEL)                 # (B, L, D)
    text_feats_ = jnp.tile(text_feats[:, None], (1, T, 1, 1)).reshape(BT, L, D_MODEL)

    # TODO(synk): sequence assembly kept as XLA concatenate (negligible bytes
    #   at these sizes); padded keys are masked inside the fusion kernel.
    fusion_tok = jnp.broadcast_to(params['fusion_token'][None, None, :],
                                  (BT, 1, D_MODEL))
    x = jnp.concatenate([fusion_tok, concatenated, text_feats_], axis=1)   # (BT, S, D)
    S = x.shape[1]
    Spad = _round_up(S, 8)
    if Spad != S:
        x = jnp.pad(x, ((0, 0), (0, Spad - S), (0, 0)))

    x = run_fusion_xformer(x, params['xf'], s_valid=S)

    fused = x[:, 0, :].reshape(B, T, D_MODEL)
    return fused, text_feats


# -------------------------------- main --------------------------------
if __name__ == "__main__":
    key = jax.random.PRNGKey(0)
    k_frames, k_text, k_param = jax.random.split(key, 3)

    B, T, C, H, W = 2, 2, 3, 16, 16
    L = 8
    sensors = sorted(["camera_nav", "camera_manip"])
    fkeys = jax.random.split(k_frames, len(sensors))
    frames = {s: jax.random.normal(fk, (B, T, C, H, W), jnp.float32)
              for s, fk in zip(sensors, fkeys)}
    # TODO(synk): stands in for frozen T5-small last_hidden_state (B, L, 512).
    text_encoder_feats = jax.random.normal(k_text, (B, L, TEXT_DIM), jnp.float32)

    params = init_params(k_param, sensors)

    fused, text_feats = forward(frames, text_encoder_feats, params)
    jax.block_until_ready((fused, text_feats))
    assert fused.shape == (B, T, D_MODEL)
    assert text_feats.shape == (B, L, D_MODEL)
    assert jnp.all(jnp.isfinite(fused)) and jnp.all(jnp.isfinite(text_feats))
    print("KERNEL_OK")
</pallas_src>

<mosaic_0001>
module attributes {stable_mosaic.version = 11 : i64} {
  func.func @visual_pipeline_kernel(%arg0: i32, %arg1: i32, %arg2: memref<1x16x192xf32, #tpu.memory_space<vmem>>, %arg3: memref<192x128xbf16, #tpu.memory_space<vmem>>, %arg4: memref<1x128xf32, #tpu.memory_space<vmem>>, %arg5: memref<128x128xbf16, #tpu.memory_space<vmem>>, %arg6: memref<1x128xf32, #tpu.memory_space<vmem>>, %arg7: memref<128x128xbf16, #tpu.memory_space<vmem>>, %arg8: memref<1x128xf32, #tpu.memory_space<vmem>>, %arg9: memref<1x128xf32, #tpu.memory_space<vmem>>, %arg10: memref<1x128xf32, #tpu.memory_space<vmem>>, %arg11: memref<1x1x128xf32, #tpu.memory_space<vmem>>, %arg12: memref<1x16x128xf32, #tpu.memory_space<vmem>>) attributes {dimension_semantics = [#tpu.dimension_semantics<parallel>, #tpu.dimension_semantics<parallel>], iteration_bounds = array<i64: 2, 1>, scalar_prefetch = 0 : i64, scratch_operands = 0 : i64, tpu.core_type = #tpu.core_type<tc>, window_params = [{transform_indices = @transform_0, window_bounds = array<i64: 1, 16, 192>}, {pipeline_mode = #tpu.pipeline_mode<synchronous>, transform_indices = @transform_1, window_bounds = array<i64: 192, 128>}, {pipeline_mode = #tpu.pipeline_mode<synchronous>, transform_indices = @transform_2, window_bounds = array<i64: 1, 128>}, {pipeline_mode = #tpu.pipeline_mode<synchronous>, transform_indices = @transform_3, window_bounds = array<i64: 128, 128>}, {pipeline_mode = #tpu.pipeline_mode<synchronous>, transform_indices = @transform_4, window_bounds = array<i64: 1, 128>}, {pipeline_mode = #tpu.pipeline_mode<synchronous>, transform_indices = @transform_5, window_bounds = array<i64: 128, 128>}, {pipeline_mode = #tpu.pipeline_mode<synchronous>, transform_indices = @transform_6, window_bounds = array<i64: 1, 128>}, {pipeline_mode = #tpu.pipeline_mode<synchronous>, transform_indices = @transform_7, window_bounds = array<i64: 1, 128>}, {pipeline_mode = #tpu.pipeline_mode<synchronous>, transform_indices = @transform_8, window_bounds = array<i64: 1, 128>}, {transform_indices = @transform_9, window_bounds = array<i64: 1, 1, 128>}, {transform_indices = @transform_10, window_bounds = array<i64: 1, 16, 128>}]} {
    %c0 = arith.constant 0 : index
    %c0_0 = arith.constant 0 : index
    %c0_1 = arith.constant 0 : index
    %0 = vector.load %arg2[%c0, %c0_0, %c0_1] : memref<1x16x192xf32, #tpu.memory_space<vmem>>, vector<1x16x192xf32>
    %1 = vector.shape_cast %0 : vector<1x16x192xf32> to vector<16x192xf32>
    %2 = arith.truncf %1 : vector<16x192xf32> to vector<16x192xbf16>
    %c0_2 = arith.constant 0 : index
    %c0_3 = arith.constant 0 : index
    %3 = vector.load %arg3[%c0_2, %c0_3] : memref<192x128xbf16, #tpu.memory_space<vmem>>, vector<192x128xbf16>
    %cst = arith.constant dense<0.000000e+00> : vector<16x128xf32>
    %4 = tpu.matmul %2, %3, %cst {dimension_numbers = #tpu.dot_dimension_numbers<[1], [0], [0], [1], [0, 0, 1, 1], [], []>} : vector<16x192xbf16>, vector<192x128xbf16>, vector<16x128xf32> -> vector<16x128xf32>
    %c0_4 = arith.constant 0 : index
    %c0_5 = arith.constant 0 : index
    %5 = vector.load %arg4[%c0_4, %c0_5] : memref<1x128xf32, #tpu.memory_space<vmem>>, vector<1x128xf32>
    %6 = vector.broadcast %5 : vector<1x128xf32> to vector<16x128xf32>
    %7 = arith.addf %4, %6 : vector<16x128xf32>
    %cst_6 = arith.constant 0.000000e+00 : f32
    %8 = vector.broadcast %cst_6 : f32 to vector<16x128xf32>
    %9 = arith.maximumf %7, %8 : vector<16x128xf32>
    %10 = arith.truncf %9 : vector<16x128xf32> to vector<16x128xbf16>
    %c0_7 = arith.constant 0 : index
    %c0_8 = arith.constant 0 : index
    %11 = vector.load %arg5[%c0_7, %c0_8] : memref<128x128xbf16, #tpu.memory_space<vmem>>, vector<128x128xbf16>
    %cst_9 = arith.constant dense<0.000000e+00> : vector<16x128xf32>
    %12 = tpu.matmul %10, %11, %cst_9 {dimension_numbers = #tpu.dot_dimension_numbers<[1], [0], [0], [1], [0, 0, 1, 1], [], []>} : vector<16x128xbf16>, vector<128x128xbf16>, vector<16x128xf32> -> vector<16x128xf32>
    %c0_10 = arith.constant 0 : index
    %c0_11 = arith.constant 0 : index
    %13 = vector.load %arg6[%c0_10, %c0_11] : memref<1x128xf32, #tpu.memory_space<vmem>>, vector<1x128xf32>
    %14 = vector.broadcast %13 : vector<1x128xf32> to vector<16x128xf32>
    %15 = arith.addf %12, %14 : vector<16x128xf32>
    %cst_12 = arith.constant 0.000000e+00 : f32
    %16 = vector.broadcast %cst_12 : f32 to vector<16x128xf32>
    %17 = arith.maximumf %15, %16 : vector<16x128xf32>
    %18 = arith.truncf %17 : vector<16x128xf32> to vector<16x128xbf16>
    %c0_13 = arith.constant 0 : index
    %c0_14 = arith.constant 0 : index
    %19 = vector.load %arg7[%c0_13, %c0_14] : memref<128x128xbf16, #tpu.memory_space<vmem>>, vector<128x128xbf16>
    %cst_15 = arith.constant dense<0.000000e+00> : vector<16x128xf32>
    %20 = tpu.matmul %18, %19, %cst_15 {dimension_numbers = #tpu.dot_dimension_numbers<[1], [0], [0], [1], [0, 0, 1, 1], [], []>} : vector<16x128xbf16>, vector<128x128xbf16>, vector<16x128xf32> -> vector<16x128xf32>
    %c0_16 = arith.constant 0 : index
    %c0_17 = arith.constant 0 : index
    %21 = vector.load %arg8[%c0_16, %c0_17] : memref<1x128xf32, #tpu.memory_space<vmem>>, vector<1x128xf32>
    %22 = vector.broadcast %21 : vector<1x128xf32> to vector<16x128xf32>
    %23 = arith.addf %20, %22 : vector<16x128xf32>
    %c0_18 = arith.constant 0 : index
    %c0_19 = arith.constant 0 : index
    %24 = vector.load %arg9[%c0_18, %c0_19] : memref<1x128xf32, #tpu.memory_space<vmem>>, vector<1x128xf32>
    %c0_20 = arith.constant 0 : index
    %c0_21 = arith.constant 0 : index
    %25 = vector.load %arg10[%c0_20, %c0_21] : memref<1x128xf32, #tpu.memory_space<vmem>>, vector<1x128xf32>
    %cst_22 = arith.constant dense<0.000000e+00> : vector<16xf32>
    %26 = vector.multi_reduction <add>, %23, %cst_22 [1] : vector<16x128xf32> to vector<16xf32>
    %27 = vector.shape_cast %26 : vector<16xf32> to vector<16x1xf32>
    %cst_23 = arith.constant 1.280000e+02 : f32
    %28 = vector.broadcast %cst_23 : f32 to vector<16x1xf32>
    %29 = arith.divf %27, %28 : vector<16x1xf32>
    %30 = vector.broadcast %29 : vector<16x1xf32> to vector<16x128xf32>
    %31 = arith.subf %23, %30 : vector<16x128xf32>
    %32 = arith.mulf %31, %31 : vector<16x128xf32>
    %cst_24 = arith.constant dense<0.000000e+00> : vector<16xf32>
    %33 = vector.multi_reduction <add>, %32, %cst_24 [1] : vector<16x128xf32> to vector<16xf32>
    %34 = vector.shape_cast %33 : vector<16xf32> to vector<16x1xf32>
    %cst_25 = arith.constant 1.280000e+02 : f32
    %35 = vector.broadcast %cst_25 : f32 to vector<16x1xf32>
    %36 = arith.divf %34, %35 : vector<16x1xf32>
    %37 = vector.broadcast %29 : vector<16x1xf32> to vector<16x128xf32>
    %38 = arith.subf %23, %37 : vector<16x128xf32>
    %cst_26 = arith.constant 9.99999974E-6 : f32
    %39 = vector.broadcast %cst_26 : f32 to vector<16x1xf32>
    %40 = arith.addf %36, %39 : vector<16x1xf32>
    %41 = math.rsqrt %40 : vector<16x1xf32>
    %42 = vector.broadcast %41 : vector<16x1xf32> to vector<16x128xf32>
    %43 = arith.mulf %38, %42 : vector<16x128xf32>
    %44 = vector.broadcast %24 : vector<1x128xf32> to vector<16x128xf32>
    %45 = arith.mulf %43, %44 : vector<16x128xf32>
    %46 = vector.broadcast %25 : vector<1x128xf32> to vector<16x128xf32>
    %47 = arith.addf %45, %46 : vector<16x128xf32>
    %cst_27 = arith.constant 0.000000e+00 : f32
    %48 = vector.broadcast %cst_27 : f32 to vector<16x128xf32>
    %49 = arith.maximumf %47, %48 : vector<16x128xf32>
    %c0_28 = arith.constant 0 : index
    %c0_29 = arith.constant 0 : index
    %c0_30 = arith.constant 0 : index
    %50 = vector.load %arg11[%c0_28, %c0_29, %c0_30] : memref<1x1x128xf32, #tpu.memory_space<vmem>>, vector<1x1x128xf32>
    %51 = vector.shape_cast %50 : vector<1x1x128xf32> to vector<1x128xf32>
    %52 = vector.broadcast %51 : vector<1x128xf32> to vector<16x128xf32>
    %53 = arith.addf %49, %52 : vector<16x128xf32>
    %c0_31 = arith.constant 0 : index
    %c0_32 = arith.constant 0 : index
    %c0_33 = arith.constant 0 : index
    %54 = vector.load %arg12[%c0_31, %c0_32, %c0_33] : memref<1x16x128xf32, #tpu.memory_space<vmem>>, vector<1x16x128xf32>
    %55 = vector.shape_cast %54 : vector<1x16x128xf32> to vector<16x128xf32>
    %56 = vector.shape_cast %53 : vector<16x128xf32> to vector<1x16x128xf32>
    tpu.vector_store %arg12[%c0_31, %c0_32, %c0_33], %56 {strides = array<i32>} : memref<1x16x128xf32, #tpu.memory_space<vmem>>, vector<1x16x128xf32>,
    return
  }
  func.func @transform_0(%arg0: i32, %arg1: i32) -> (i32, i32, i32) {
    %c0_i32 = arith.constant 0 : i32
    %c0_i32_0 = arith.constant 0 : i32
    return %arg0, %arg1, %c0_i32 : i32, i32, i32
  }
  func.func @transform_1(%arg0: i32, %arg1: i32) -> (i32, i32) {
    %c0_i32 = arith.constant 0 : i32
    %c0_i32_0 = arith.constant 0 : i32
    %c0_i32_1 = arith.constant 0 : i32
    return %c0_i32, %c0_i32_0 : i32, i32
  }
  func.func @transform_2(%arg0: i32, %arg1: i32) -> (i32, i32) {
    %c0_i32 = arith.constant 0 : i32
    %c0_i32_0 = arith.constant 0 : i32
    %c0_i32_1 = arith.constant 0 : i32
    return %c0_i32, %c0_i32_0 : i32, i32
  }
  func.func @transform_3(%arg0: i32, %arg1: i32) -> (i32, i32) {
    %c0_i32 = arith.constant 0 : i32
    %c0_i32_0 = arith.constant 0 : i32
    %c0_i32_1 = arith.constant 0 : i32
    return %c0_i32, %c0_i32_0 : i32, i32
  }
  func.func @transform_4(%arg0: i32, %arg1: i32) -> (i32, i32) {
    %c0_i32 = arith.constant 0 : i32
    %c0_i32_0 = arith.constant 0 : i32
    %c0_i32_1 = arith.constant 0 : i32
    return %c0_i32, %c0_i32_0 : i32, i32
  }
  func.func @transform_5(%arg0: i32, %arg1: i32) -> (i32, i32) {
    %c0_i32 = arith.constant 0 : i32
    %c0_i32_0 = arith.constant 0 : i32
    %c0_i32_1 = arith.constant 0 : i32
    return %c0_i32, %c0_i32_0 : i32, i32
  }
  func.func @transform_6(%arg0: i32, %arg1: i32) -> (i32, i32) {
    %c0_i32 = arith.constant 0 : i32
    %c0_i32_0 = arith.constant 0 : i32
    %c0_i32_1 = arith.constant 0 : i32
    return %c0_i32, %c0_i32_0 : i32, i32
  }
  func.func @transform_7(%arg0: i32, %arg1: i32) -> (i32, i32) {
    %c0_i32 = arith.constant 0 : i32
    %c0_i32_0 = arith.constant 0 : i32
    %c0_i32_1 = arith.constant 0 : i32
    return %c0_i32, %c0_i32_0 : i32, i32
  }
  func.func @transform_8(%arg0: i32, %arg1: i32) -> (i32, i32) {
    %c0_i32 = arith.constant 0 : i32
    %c0_i32_0 = arith.constant 0 : i32
    %c0_i32_1 = arith.constant 0 : i32
    return %c0_i32, %c0_i32_0 : i32, i32
  }
  func.func @transform_9(%arg0: i32, %arg1: i32) -> (i32, i32, i32) {
    %c0_i32 = arith.constant 0 : i32
    %c0_i32_0 = arith.constant 0 : i32
    %c0_i32_1 = arith.constant 0 : i32
    return %arg0, %c0_i32, %c0_i32_0 : i32, i32, i32
  }
  func.func @transform_10(%arg0: i32, %arg1: i32) -> (i32, i32, i32) {
    %c0_i32 = arith.constant 0 : i32
    %c0_i32_0 = arith.constant 0 : i32
    return %arg0, %arg1, %c0_i32 : i32, i32, i32
  }
}

</mosaic_0001>

<bundles_post_ra>
// kernel: tpu_custom_call.1
= control target key start
LH: loop header
LB: loop body
LE: loop exit
PB: predicated region body
PF: predicated region fallthrough
CT: control target
= control target key end

     0   :  { %s2410_s0 = inlined_call_operand.hbm [shape: f32[2,16,192], index: 0, kind: input, shape index: {}]   ;;  %s2411_s1 = inlined_call_operand.hbm [shape: bf16[192,128], index: 1, kind: input, shape index: {}]   ;;  %s2412_s2 = inlined_call_operand.hbm [shape: f32[1,128], index: 2, kind: input, shape index: {}]   ;;  %s2413_s3 = inlined_call_operand.hbm [shape: bf16[128,128], index: 3, kind: input, shape index: {}]   ;;  %s2414_s4 = inlined_call_operand.hbm [shape: f32[1,128], index: 4, kind: input, shape index: {}]   ;;  %s2415_s5 = inlined_call_operand.hbm [shape: bf16[128,128], index: 5, kind: input, shape index: {}]   ;;  %s2416_s6 = inlined_call_operand.hbm [shape: f32[1,128], index: 6, kind: input, shape index: {}]   ;;  %s2417_s7 = inlined_call_operand.hbm [shape: f32[1,128], index: 7, kind: input, shape index: {}]   ;;  %s2418_s8 = inlined_call_operand.hbm [shape: f32[1,128], index: 8, kind: input, shape index: {}]   ;;  %s2419_s9 = inlined_call_operand.hbm [shape: f32[2,1,128], index: 9, kind: input, shape index: {}]   ;;  %s2420_s10 = inlined_call_operand.hbm [shape: f32[2,16,128], index: 10, kind: output, shape index: {}]  }
   0x1   :  { %2430 = sst [smem:[#allocation29_spill]] %s2410_s0 }
   0x2   :  { %2431 = sst [smem:[#allocation30_spill]] %s2411_s1 }
   0x3   :  { %2432 = sst [smem:[#allocation31_spill]] %s2412_s2 }
   0x4   :  { %2433 = sst [smem:[#allocation32_spill]] %s2413_s3 }
   0x5   :  { %2434 = sst [smem:[#allocation33_spill]] %s2414_s4 }
   0x6   :  { %2435 = sst [smem:[#allocation34_spill]] %s2419_s9 }
   0x7   :  { %2436 = sst [smem:[#allocation35_spill]] %s2420_s10 }
   0x8   :  { %15 = vsyncpa [#allocation3], 0 }
   0x9   :  { %17 = vsyncpa [#allocation3 + $0x1], 0 }
   0xa   :  { %18 = vsyncpa [#allocation6], 0 }
   0xb   :  { %19 = vsyncpa [#allocation9], 0 }
   0xc   :  { %20 = vsyncpa [#allocation12], 0 }
   0xd   :  { %21 = vsyncpa [#allocation15], 0 }
   0xe   :  { %22 = vsyncpa [#allocation18], 0 }
   0xf   :  { %24 = vsyncpa [#allocation18 + $0x1], 0 }
  0x10   :  { %25 = vsyncpa [#allocation4], 0 }
  0x11   :  { %27 = vsyncpa [#allocation4 + $0x1], 0  ;;  %s1956_s13 = smov 0   ;;  %s1958_s14 = smov 0  }
  0x12   :  { %s1960_s15 = smov 0   ;;  %s1962_s16 = smov 0  }
  0x13   :  { %s1964_s17 = smov 0   ;;  %s1966_s18 = smov 0  }
  0x14 LB: > { %2437 = sst [smem:[#allocation27_spill]] %s1871_s16  ;;  %s2421_s19 = sadd.s32 4294967295, %s1879_s18   ;;  %s1879_s18 = sphi %s1966_s18, %s33_s18   ;;  %s1875_s17 = sphi %s1964_s17, %s2469_s17   ;;  %s1871_s16 = sphi %s1962_s16, %s2468_s16   ;;  %s1867_s15 = sphi %s1960_s15, %s2467_s15   ;;  %s1863_s14 = sphi %s1958_s14, %s2466_s14   ;;  %s1859_s13 = sphi %s1956_s13, %s2465_s13  }
  0x15   : > { %p1179_p0 = scmp.ge.s32.totalorder %s1879_s18, 1  ;;  %p1990_p1 = scmp.eq.s32.totalorder %s2421_s19, 0 }
  0x16   : > { %p300_p2 = scmp.lt.s32.totalorder %s1879_s18, 3  ;;  %s1881_s22 = smov [#allocation5]  }
  0x17   : > { %s2438_s20 = scalar_select %p1990_p1, 1, 0 }
  0x18   : > { %p1995_p3 = pnand %p1179_p0, %p300_p2  ;;  %s312_s23 = sshll.u32 %s1881_s22, 4  ;;  %s1999_s23 = int_to_ptr.vmem [resolvable:$true] %s312_s23 }
  0x19   : > { %s1882_s25 = smov [#allocation8]   ;;  %s1883_s27 = smov [#allocation11]  }
  0x1a   : > { %s2439_s21 = scalar_select %p1995_p3, 1, 0 }
  0x1b   : > { %p1342_p4 = pneg %p1995_p3  ;;  %s336_s26 = sshll.u32 %s1882_s25, 4  ;;  %s2010_s26 = int_to_ptr.vmem [resolvable:$true] %s336_s26 }
  0x1c   : > { %2440 = sst [smem:[#allocation28_spill]] %s2439_s21  ;;  %s2012_s28 = sshll.u32 %s1883_s27, 4  ;;  %s361_s28 = int_to_ptr.vmem [resolvable:$true] %s2012_s28 }
  0x1d   : > { %p2006_p6 = pnand %p1342_p4, %p1990_p1  ;;  %s2442_s1 = sld [smem:[#allocation30_spill]] }
  0x1f   : > { %p2022_p8 = pneg %p2006_p6 }
  0x23   : > { %s1493_s11 = scalar_lea.hbm %s2442_s1, 1536 }
  0x24   : > { %p1494_p7 = scmp.ne.s32.totalorder %s2442_s1, %s1493_s11  ;;  %p1500_p11 = scmp.lt.u32.totalorder %s1493_s11, %s2442_s1 }
  0x26   : > { %p1496_p9 = pnand %p2022_p8, %p1494_p7 }
  0x28   : > { %p1497_p10 = pneg %p1496_p9 }
  0x2a   : > { %p1502_p12 = pnand %p1500_p11, %p1497_p10 }
  0x2c   : > { %1505 = shalt.err (!%p1502_p12)
}
  0x2d   : > { %s1506_s29 = scalar_lea.vmem %s1999_s23, 1536  ;;  %p1514_p4 = scmp.lt.s32.totalorder %s1999_s23, %s1999_s23 }
  0x2e   : > { %p1507_p13 = scmp.ne.s32.totalorder %s1999_s23, %s1506_s29  ;;  %p1515_p5 = scmp.lt.s32.totalorder %s1506_s29, %s1506_s29 }
  0x30   : > { %p1509_p0 = pnand %p1507_p13, %p2022_p8  ;;  %p1516_p7 = por %p1515_p5, %p1514_p4 }
  0x32   : > { %p1510_p2 = pneg %p1509_p0 }
  0x34   : > { %p1517_p9 = pnand %p1516_p7, %p1510_p2 }
  0x36   : > { %1520 = shalt.err (!%p1517_p9)
}
  0x37   : > { %s1884_s30 = smov 64   ;;  %s1885_s11 = smov 4  }
  0x38   : > { %1345 = dma.hbm_to_vmem [thread:$0]  (!%p2006_p6), %s2442_s1, 1536, %s1999_s23, [#allocation6], %s1884_s30, %s1884_s30, %s1885_s11  }
  0x39   : > { %s2444_s3 = sld [smem:[#allocation32_spill]] }
  0x3f   : > { %s1521_s29 = scalar_lea.hbm %s2444_s3, 1024 }
  0x40   : > { %p1522_p5 = scmp.ne.s32.totalorder %s2444_s3, %s1521_s29  ;;  %p1528_p12 = scmp.lt.u32.totalorder %s1521_s29, %s2444_s3 }
  0x42   : > { %p1524_p10 = pnand %p1522_p5, %p2022_p8 }
  0x44   : > { %p1525_p11 = pneg %p1524_p10 }
  0x46   : > { %p1530_p13 = pnand %p1528_p12, %p1525_p11 }
  0x48   : > { %1533 = shalt.err (!%p1530_p13)
}
  0x49   : > { %s1534_s23 = scalar_lea.vmem %s2010_s26, 1024  ;;  %p1542_p7 = scmp.lt.s32.totalorder %s2010_s26, %s2010_s26 }
  0x4a   : > { %p1535_p0 = scmp.ne.s32.totalorder %s2010_s26, %s1534_s23  ;;  %p1543_p9 = scmp.lt.s32.totalorder %s1534_s23, %s1534_s23 }
  0x4c   : > { %p1537_p2 = pnand %p1535_p0, %p2022_p8  ;;  %p1544_p5 = por %p1543_p9, %p1542_p7 }
  0x4e   : > { %p1538_p4 = pneg %p1537_p2 }
  0x50   : > { %p1545_p10 = pnand %p1544_p5, %p1538_p4 }
  0x52   : > { %1548 = shalt.err (!%p1545_p10)
}
  0x53   : > { %1351 = dma.hbm_to_vmem [thread:$0]  (!%p2006_p6), %s2444_s3, 1024, %s2010_s26, [#allocation9], %s1884_s30, %s1884_s30, %s1885_s11  }
  0x54   : > { %s1549_s12 = scalar_lea.hbm %s2415_s5, 1024 }
  0x55   : > { %p1550_p11 = scmp.ne.s32.totalorder %s2415_s5, %s1549_s12  ;;  %p1556_p0 = scmp.lt.u32.totalorder %s1549_s12, %s2415_s5 }
  0x57   : > { %p1552_p12 = pnand %p1550_p11, %p2022_p8 }
  0x59   : > { %p1553_p13 = pneg %p1552_p12 }
  0x5b   : > { %p1558_p2 = pnand %p1556_p0, %p1553_p13 }
  0x5d   : > { %1561 = shalt.err (!%p1558_p2)
}
  0x5e   : > { %s1562_s23 = scalar_lea.vmem %s361_s28, 1024  ;;  %p1570_p5 = scmp.lt.s32.totalorder %s361_s28, %s361_s28 }
  0x5f   : > { %p1563_p4 = scmp.ne.s32.totalorder %s361_s28, %s1562_s23  ;;  %p1571_p10 = scmp.lt.s32.totalorder %s1562_s23, %s1562_s23 }
  0x61   : > { %p1565_p7 = pnand %p1563_p4, %p2022_p8  ;;  %p1572_p3 = por %p1571_p10, %p1570_p5 }
  0x63   : > { %p1566_p9 = pneg %p1565_p7 }
  0x65   : > { %p1573_p1 = pnand %p1572_p3, %p1566_p9 }
  0x67   : > { %1576 = shalt.err (!%p1573_p1)
}
  0x68   : > { %1357 = dma.hbm_to_vmem [thread:$0]  (!%p2006_p6), %s2415_s5, 1024, %s361_s28, [#allocation12], %s1884_s30, %s1884_s30, %s1885_s11  }
  0x69   : > { %s1886_s10 = smov [#allocation14]   ;;  %s1887_s21 = smov [#allocation7]  }
  0x6a   : > { %s385_s16 = sshll.u32 %s1886_s10, 4  ;;  %s326_s12 = sshll.u32 %s1887_s21, 4  ;;  %s386_s16 = int_to_ptr.vmem [resolvable:$true] %s385_s16  ;;  %s327_s12 = int_to_ptr.vmem [resolvable:$true] %s326_s12 }
  0x6b   : > { %s1577_s27 = scalar_lea.hbm %s2417_s7, 16 }
  0x6c   : > { %p1578_p1 = scmp.ne.s32.totalorder %s2417_s7, %s1577_s27  ;;  %p1584_p12 = scmp.lt.u32.totalorder %s1577_s27, %s2417_s7 }
  0x6e   : > { %p1580_p3 = pnand %p1578_p1, %p2022_p8 }
  0x70   : > { %p1581_p11 = pneg %p1580_p3 }
  0x72   : > { %p1586_p13 = pnand %p1584_p12, %p1581_p11 }
  0x74   : > { %1589 = shalt.err (!%p1586_p13)
}
  0x75   : > { %s1590_s28 = scalar_lea.vmem %s386_s16, 16  ;;  %s1597_s30 = scalar_lea.vmem %s386_s16, 32 }
  0x76   : > { %p1591_p0 = scmp.ne.s32.totalorder %s386_s16, %s1590_s28  ;;  %p1598_p7 = scmp.lt.s32.totalorder %s386_s16, %s386_s16 }
  0x77   : > { %p1599_p9 = scmp.lt.s32.totalorder %s1597_s30, %s1590_s28 }
  0x78   : > { %p1593_p2 = pnand %p1591_p0, %p2022_p8 }
  0x79   : > { %p1600_p5 = por %p1599_p9, %p1598_p7 }
  0x7a   : > { %p1594_p4 = pneg %p1593_p2 }
  0x7c   : > { %p1601_p10 = pnand %p1600_p5, %p1594_p4 }
  0x7e   : > { %1604 = shalt.err (!%p1601_p10)
}
  0x7f   : > { %1363 = dma.hbm_to_vmem [thread:$0]  (!%p2006_p6), %s2417_s7, 16, %s386_s16, [#allocation15]  }
  0x80   : > { %s2445_s2 = sld [smem:[#allocation31_spill]] }
  0x86   : > { %s1605_s21 = scalar_lea.hbm %s2445_s2, 16 }
  0x87   : > { %p1606_p1 = scmp.ne.s32.totalorder %s2445_s2, %s1605_s21  ;;  %p1612_p12 = scmp.lt.u32.totalorder %s1605_s21, %s2445_s2 }
  0x89   : > { %p1608_p3 = pnand %p1606_p1, %p2022_p8 }
  0x8b   : > { %p1609_p11 = pneg %p1608_p3 }
  0x8d   : > { %p1614_p13 = pnand %p1612_p12, %p1609_p11 }
  0x8f   : > { %1617 = shalt.err (!%p1614_p13)
}
  0x90   : > { %s1618_s23 = scalar_lea.vmem %s327_s12, 16  ;;  %s1625_s16 = scalar_lea.vmem %s327_s12, 32 }
  0x91   : > { %p1619_p0 = scmp.ne.s32.totalorder %s327_s12, %s1618_s23  ;;  %p1626_p7 = scmp.lt.s32.totalorder %s327_s12, %s327_s12 }
  0x92   : > { %p1627_p9 = scmp.lt.s32.totalorder %s1625_s16, %s1618_s23 }
  0x93   : > { %p1621_p2 = pnand %p1619_p0, %p2022_p8 }
  0x94   : > { %p1628_p5 = por %p1627_p9, %p1626_p7 }
  0x95   : > { %p1622_p4 = pneg %p1621_p2 }
  0x97   : > { %p1629_p10 = pnand %p1628_p5, %p1622_p4 }
  0x99   : > { %1632 = shalt.err (!%p1629_p10)
}
  0x9a   : > { %1348 = dma.hbm_to_vmem [thread:$0]  (!%p2006_p6), %s2445_s2, 16, %s327_s12, [#allocation6]  }
  0x9b   : > { %s1888_s30 = smov [#allocation10]   ;;  %s1889_s9 = smov [#allocation13]  }
  0x9c   : > { %s350_s11 = sshll.u32 %s1888_s30, 4  ;;  %s374_s1 = sshll.u32 %s1889_s9, 4  ;;  %s351_s11 = int_to_ptr.vmem [resolvable:$true] %s350_s11  ;;  %s375_s1 = int_to_ptr.vmem [resolvable:$true] %s374_s1 }
  0x9d   : > { %s2446_s4 = sld [smem:[#allocation33_spill]] }
  0xa3   : > { %s1633_s22 = scalar_lea.hbm %s2446_s4, 16 }
  0xa4   : > { %p1634_p1 = scmp.ne.s32.totalorder %s2446_s4, %s1633_s22  ;;  %p1640_p12 = scmp.lt.u32.totalorder %s1633_s22, %s2446_s4 }
  0xa6   : > { %p1636_p3 = pnand %p1634_p1, %p2022_p8 }
  0xa8   : > { %p1637_p11 = pneg %p1636_p3 }
  0xaa   : > { %p1642_p13 = pnand %p1640_p12, %p1637_p11 }
  0xac   : > { %1645 = shalt.err (!%p1642_p13)
}
  0xad   : > { %s1646_s12 = scalar_lea.vmem %s351_s11, 16  ;;  %s1653_s16 = scalar_lea.vmem %s351_s11, 32 }
  0xae   : > { %p1647_p0 = scmp.ne.s32.totalorder %s351_s11, %s1646_s12  ;;  %p1654_p7 = scmp.lt.s32.totalorder %s351_s11, %s351_s11 }
  0xaf   : > { %p1655_p9 = scmp.lt.s32.totalorder %s1653_s16, %s1646_s12 }
  0xb0   : > { %p1649_p2 = pnand %p1647_p0, %p2022_p8 }
  0xb1   : > { %p1656_p5 = por %p1655_p9, %p1654_p7 }
  0xb2   : > { %p1650_p4 = pneg %p1649_p2 }
  0xb4   : > { %p1657_p10 = pnand %p1656_p5, %p1650_p4 }
  0xb6   : > { %1660 = shalt.err (!%p1657_p10)
}
  0xb7   : > { %1354 = dma.hbm_to_vmem [thread:$0]  (!%p2006_p6), %s2446_s4, 16, %s351_s11, [#allocation9]  }
  0xb8   : > { %s1661_s10 = scalar_lea.hbm %s2416_s6, 16 }
  0xb9   : > { %p1662_p1 = scmp.ne.s32.totalorder %s2416_s6, %s1661_s10  ;;  %p1668_p12 = scmp.lt.u32.totalorder %s1661_s10, %s2416_s6 }
  0xbb   : > { %p1664_p3 = pnand %p1662_p1, %p2022_p8 }
  0xbd   : > { %p1665_p11 = pneg %p1664_p3 }
  0xbf   : > { %p1670_p13 = pnand %p1668_p12, %p1665_p11 }
  0xc1   : > { %1673 = shalt.err (!%p1670_p13)
}
  0xc2   : > { %s1674_s29 = scalar_lea.vmem %s375_s1, 16  ;;  %s1681_s11 = scalar_lea.vmem %s375_s1, 32 }
  0xc3   : > { %p1675_p0 = scmp.ne.s32.totalorder %s375_s1, %s1674_s29  ;;  %p1682_p7 = scmp.lt.s32.totalorder %s375_s1, %s375_s1 }
  0xc4   : > { %p1683_p9 = scmp.lt.s32.totalorder %s1681_s11, %s1674_s29 }
  0xc5   : > { %p1677_p2 = pnand %p1675_p0, %p2022_p8 }
  0xc6   : > { %p1684_p5 = por %p1683_p9, %p1682_p7 }
  0xc7   : > { %p1678_p4 = pneg %p1677_p2 }
  0xc9   : > { %p1685_p10 = pnand %p1684_p5, %p1678_p4 }
  0xcb   : > { %1688 = shalt.err (!%p1685_p10)
}
  0xcc   : > { %1360 = dma.hbm_to_vmem [thread:$0]  (!%p2006_p6), %s2416_s6, 16, %s375_s1, [#allocation12]  }
  0xcd   : > { %s1890_s16 = smov [#allocation16]   ;;  %s1689_s9 = scalar_lea.hbm %s2418_s8, 16 }
  0xce   : > { %s396_s26 = sshll.u32 %s1890_s16, 4  ;;  %p1690_p1 = scmp.ne.s32.totalorder %s2418_s8, %s1689_s9  ;;  %s397_s26 = int_to_ptr.vmem [resolvable:$true] %s396_s26 }
  0xcf   : > { %p1696_p12 = scmp.lt.u32.totalorder %s1689_s9, %s2418_s8 }
  0xd0   : > { %p1692_p3 = pnand %p1690_p1, %p2022_p8 }
  0xd2   : > { %p1693_p11 = pneg %p1692_p3 }
  0xd4   : > { %p1698_p13 = pnand %p1696_p12, %p1693_p11 }
  0xd6   : > { %1701 = shalt.err (!%p1698_p13)
}
  0xd7   : > { %s1702_s1 = scalar_lea.vmem %s397_s26, 16  ;;  %s1709_s27 = scalar_lea.vmem %s397_s26, 32 }
  0xd8   : > { %p1703_p0 = scmp.ne.s32.totalorder %s397_s26, %s1702_s1  ;;  %p1710_p7 = scmp.lt.s32.totalorder %s397_s26, %s397_s26 }
  0xd9   : > { %p1711_p9 = scmp.lt.s32.totalorder %s1709_s27, %s1702_s1 }
  0xda   : > { %p1705_p2 = pnand %p1703_p0, %p2022_p8 }
  0xdb   : > { %p1712_p5 = por %p1711_p9, %p1710_p7 }
  0xdc   : > { %p1706_p4 = pneg %p1705_p2 }
  0xde   : > { %p1713_p10 = pnand %p1712_p5, %p1706_p4 }
  0xe0   : > { %1716 = shalt.err (!%p1713_p10)
}
  0xe1   : > { %1366 = dma.hbm_to_vmem [thread:$0]  (!%p2006_p6), %s2418_s8, 16, %s397_s26, [#allocation15]  }
  0xe2   : > { %s1178_s19 = sadd.s32 4294967294, %s1879_s18   ;;  %s45_s23 = sadd.s32 1, %s1875_s17 }
  0xe3   : > { %p47_p8 = scmp.ge.s32.totalorder %s45_s23, 2  ;;  %s54_s24 = sadd.s32 1, %s1867_s15 }
  0xe4   : > { %p61_p1 = scmp.ne.s32.totalorder %s1867_s15, %s1863_s14  ;;  %p62_p3 = scmp.eq.s32.totalorder %s1879_s18, 0 }
  0xe5   : > { %s2471_s23 = smov (%p47_p8, %s45_s23), 0  ;;  %p67_p12 = scmp.ne.s32.totalorder %s1863_s14, %s1859_s13 }
  0xe6   : > { %p2192_p11 = por %p62_p3, %p61_p1  ;;  %s49_s16 = ssub.s32 %s1875_s17, %s2471_s23 }
  0xe7   : > { %s2448_s26 = sadd.s32 4294967295, %s1879_s18   ;;  %p52_p13 = scmp.eq.s32.totalorder %s49_s16, 0 }
  0xe8   : > { %p287_p6 = scmp.eq.s32.totalorder %s2448_s26, 1  ;;  %p2449_p0 = scmp.ne.s32.totalorder %s2438_s20, 0 }
  0xe9   : > { %p293_p7 = scmp.eq.s32.totalorder %s1178_s19, 1  ;;  %p1386_p5 = scmp.lt.s32.totalorder %s1879_s18, 2 }
  0xea   : > { %p2204_p2 = por %p2449_p0, %p67_p12  ;;  %p2208_p4 = por %p287_p6, %p61_p1 }
  0xeb   : > { %s2213_s9 = scalar_select %p52_p13, %s1867_s15, %s54_s24  }
  0xec   : > { %s2450_s28 = scalar_select %p2204_p2, 1, 0 }
  0xed   : > { %s2451_s30 = scalar_select %p2208_p4, 1, 0 }
  0xee   : > { %p2215_p9 = por %p293_p7, %p67_p12  ;;  %s2221_s21 = sand.u32 1, %s1867_s15  }
  0xef   : > { %s1244_s22 = sshll.u32 %s1875_s17, 9  ;;  %s1189_s25 = sshll.u32 %s2221_s21, 5 }
  0xf0   : > { %s2452_s10 = scalar_select %p2215_p9, 1, 0 }
  0xf1   : > { %s2453_s0 = sld [smem:[#allocation29_spill]]  ;;  %s411_s11 = scalar_lea.vmem [#allocation2], %s1189_s25 }
  0xf2   : > { %s421_s19 = sshll.u32 %s411_s11, 4  ;;  %p2232_p10 = pnand %p1386_p5, %p2192_p11  ;;  %s2236_s19 = int_to_ptr.vmem [resolvable:$true] %s421_s19 }
  0xf3   : > { %s408_s16 = scalar_lea.sflag [#allocation3], %s2221_s21 }
  0xf4   : > { %p1719_p1 = pneg %p2232_p10 }
  0xf7   : > { %s2228_s29 = scalar_lea.hbm %s2453_s0, %s1244_s22  ;;  %s1722_s12 = scalar_lea.hbm %s2453_s0, 1024 }
  0xf8   : > { %s1717_s26 = scalar_lea.hbm %s2228_s29, 512  ;;  %p1723_p11 = scmp.lt.u32.totalorder %s2228_s29, %s2453_s0 }
  0xf9   : > { %p1718_p8 = scmp.ne.s32.totalorder %s2228_s29, %s1717_s26  ;;  %p1724_p6 = scmp.lt.u32.totalorder %s1722_s12, %s1717_s26 }
  0xfa   : > { %p1726_p0 = scmp.lt.u32.totalorder %s1717_s26, %s2228_s29 }
  0xfb   : > { %p1720_p3 = pnand %p1719_p1, %p1718_p8  ;;  %p1725_p13 = por %p1724_p6, %p1723_p11 }
  0xfd   : > { %p1721_p12 = pneg %p1720_p3  ;;  %p1727_p7 = por %p1726_p0, %p1725_p13 }
  0xff   : > { %p1728_p5 = pnand %p1727_p7, %p1721_p12 }
 0x101   : > { %1731 = shalt.err (!%p1728_p5)
}
 0x102   : > { %s1732_s11 = scalar_lea.vmem %s2236_s19, 512  ;;  %s1891_s22 = smov [#allocation2]  }
 0x103   : > { %p1733_p8 = scmp.ne.s32.totalorder %s2236_s19, %s1732_s11  ;;  %s1737_s25 = sshll.u32 %s1891_s22, 4  ;;  %s1738_s25 = int_to_ptr.vmem [resolvable:$false] %s1737_s25 }
 0x104   : > { %s1739_s1 = scalar_lea.vmem %s1738_s25, 1024  ;;  %p1740_p4 = scmp.lt.s32.totalorder %s2236_s19, %s1738_s25 }
 0x105   : > { %p1735_p3 = pnand %p1733_p8, %p1719_p1  ;;  %p1741_p11 = scmp.lt.s32.totalorder %s1739_s1, %s1732_s11 }
 0x107   : > { %p1736_p9 = pneg %p1735_p3  ;;  %p1742_p6 = por %p1741_p11, %p1740_p4 }
 0x109   : > { %p1743_p13 = pnand %p1742_p6, %p1736_p9 }
 0x10b   : > { %1746 = shalt.err (!%p1743_p13)
}
 0x10c   : > { %s1892_s26 = smov 256   ;;  %s1893_s12 = smov 16  }
 0x10d   : > { %1370 = dma.hbm_to_vmem [thread:$0]  (!%p2232_p10), %s2228_s29, 512, %s2236_s19, %s408_s16, %s1892_s26, %s1892_s26, %s1893_s12  }
 0x10e   : > { %s1192_s27 = sshll.u32 %s1875_s17, 4  ;;  %s434_s22 = scalar_lea.vmem [#allocation17], %s2221_s21 }
 0x10f   : > { %s441_s25 = sshll.u32 %s434_s22, 4  ;;  %s2455_s0 = sld [smem:[#allocation34_spill]]  ;;  %s442_s25 = int_to_ptr.vmem [resolvable:$true] %s441_s25 }
 0x110   : > { %s432_s3 = scalar_lea.sflag [#allocation18], %s2221_s21 }
 0x115   : > { %s2271_s2 = scalar_lea.hbm %s2455_s0, %s1192_s27  ;;  %s1752_s16 = scalar_lea.hbm %s2455_s0, 32 }
 0x116   : > { %s1747_s4 = scalar_lea.hbm %s2271_s2, 16  ;;  %p1753_p0 = scmp.lt.u32.totalorder %s2271_s2, %s2455_s0 }
 0x117   : > { %p1748_p4 = scmp.ne.s32.totalorder %s2271_s2, %s1747_s4  ;;  %p1754_p7 = scmp.lt.u32.totalorder %s1752_s16, %s1747_s4 }
 0x118   : > { %p1756_p8 = scmp.lt.u32.totalorder %s1747_s4, %s2271_s2 }
 0x119   : > { %p1750_p9 = pnand %p1748_p4, %p1719_p1  ;;  %p1755_p5 = por %p1754_p7, %p1753_p0 }
 0x11b   : > { %p1751_p12 = pneg %p1750_p9  ;;  %p1757_p3 = por %p1756_p8, %p1755_p5 }
 0x11d   : > { %p1758_p11 = pnand %p1757_p3, %p1751_p12 }
 0x11f   : > { %1761 = shalt.err (!%p1758_p11)
}
 0x120   : > { %s1762_s21 = scalar_lea.vmem %s442_s25, 16  ;;  %s1894_s27 = smov [#allocation17]  }
 0x121   : > { %p1763_p6 = scmp.ne.s32.totalorder %s442_s25, %s1762_s21  ;;  %s1767_s22 = sshll.u32 %s1894_s27, 4  ;;  %s1768_s22 = int_to_ptr.vmem [resolvable:$false] %s1767_s22 }
 0x122   : > { %s1769_s11 = scalar_lea.vmem %s1768_s22, 32  ;;  %p1770_p9 = scmp.lt.s32.totalorder %s442_s25, %s1768_s22 }
 0x123   : > { %p1765_p13 = pnand %p1763_p6, %p1719_p1  ;;  %p1771_p2 = scmp.lt.s32.totalorder %s1769_s11, %s1762_s21 }
 0x125   : > { %p1766_p4 = pneg %p1765_p13  ;;  %p1772_p0 = por %p1771_p2, %p1770_p9 }
 0x127   : > { %p1773_p7 = pnand %p1772_p0, %p1766_p4 }
 0x129   : > { %1776 = shalt.err (!%p1773_p7)
}
 0x12a   : > { %1373 = dma.hbm_to_vmem [thread:$0]  (!%p2232_p10), %s2271_s2, 16, %s442_s25, %s432_s3  }
 0x12b   : > { %s2456_s4 = sld [smem:[#allocation28_spill]] }
 0x131   : > { %p2457_p12 = scmp.ne.s32.totalorder %s2456_s4, 0 }
 0x132   : > { %s2296_s1 = sand.u32 (!%p2457_p12), 1, %s1863_s14   ;;  %p2458_p2 = scmp.ne.s32.totalorder (!%p2457_p12), %s2450_s28, 0 }
 0x133   : > { %450 = sbr.rel (%p2457_p12) target bundleno = 1363 (0x553), region = 60  ;;  %s1194_s29 = sshll.u32 (!%p2457_p12), %s2296_s1, 5 }
 0x134   : > { %s453_s19 = scalar_lea.sflag (!%p2457_p12), [#allocation3], %s2296_s1  ;;  %s2300_s16 = scalar_lea.vmem (!%p2457_p12), [#allocation2], %s1194_s29 }
 0x13a   : > { %1830 = dma.done.wait (%p2458_p2), %s453_s19, 512  }
 0x13b   : > { %1832 = vsyncadd (%p2458_p2), %s453_s19, 4294966784  ;;  %p2459_p10 = scmp.ne.s32.totalorder %s2438_s20, 0 }
 0x13d   : > { %1834 = dma.done.wait (%p2459_p10), [#allocation6], 1552  }
 0x13e   : > { %1836 = vsyncadd (%p2459_p10), [#allocation6], 4294965744 }
 0x13f   : > { %1838 = dma.done.wait (%p2459_p10), [#allocation9], 1040  }
 0x140   : > { %1840 = vsyncadd (%p2459_p10), [#allocation9], 4294966256 }
 0x141   : > { %1842 = dma.done.wait (%p2459_p10), [#allocation12], 1040  }
 0x142   : > { %1844 = vsyncadd (%p2459_p10), [#allocation12], 4294966256 }
 0x143   : > { %1846 = dma.done.wait (%p2459_p10), [#allocation15], 32  }
 0x144   : > { %1848 = vsyncadd (%p2459_p10), [#allocation15], 4294967264  ;;  %s494_s2 = scalar_lea.sflag [#allocation18], %s2296_s1  ;;  %s496_s3 = scalar_lea.vmem [#allocation17], %s2296_s1 }
 0x145   : > { %1850 = dma.done.wait (%p2458_p2), %s494_s2, 16  }
 0x146   : > { %1852 = vsyncadd (%p2458_p2), %s494_s2, 4294967280  ;;  %v1895_v0 = vmov 0   ;;  %v1896_v1 = vmov 0.0   ;;  %v1461_v2 = vld [vmem:[#allocation5] sm:$0xff]   ;;  %v1462_v3 = vld [vmem:[#allocation5 + $0x8] sm:$0xff]   ;;  %vm649_vm0 = vcmask 523264  }
 0x147   : > { %653 = vmatprep.subr.bf16.mxu0 %v1895_v0  ;;  %1264 = vmatprep.subr.bf16.mxu1 %v1896_v1  ;;  %v1463_v4 = vld [vmem:[#allocation5 + $0x10] sm:$0xff]   ;;  %v1464_v5 = vld [vmem:[#allocation5 + $0x18] sm:$0xff]   ;;  %v541_v6 = vld [vmem:[%s2300_s16 + $0x8] sm:$0xff]  ;;  %vm1897_vm1 = vmmov 0   ;;  %s2460_s20 = sld [smem:[#allocation27_spill]]  ;;  %s1203_s28 = sshll.u32 %s2296_s1, 4 }
 0x148   : > { %654 = vmatpush1.bf16.msra.mxu0 %v1461_v2  ;;  %v543_v7 = vld [vmem:[%s2300_s16 + $0x18] sm:$0xff]  ;;  %v1465_v8 = vld [vmem:[#allocation5 + $0x20] sm:$0xff]   ;;  %v1474_v11 = vld [vmem:[#allocation8 + $0x8] sm:$0xff]   ;;  %1280 = vmatprep.mubr.msk.bf16.mxu1 %vm1897_vm1, %v1896_v1  ;;  %s536_s25 = scalar_lea.vmem [#allocation19], %s1203_s28  ;;  %s2461_s27 = sld [smem:[#allocation35_spill]] }
 0x149   : > { %655 = vmatprep.subr.bf16.mxu0 %v1895_v0  ;;  %v545_v9 = vpack.c.bf16 %v543_v7, %v541_v6  ;;  %v1473_v10 = vld [vmem:[#allocation8] sm:$0xff]   ;;  %v1475_v13 = vld [vmem:[#allocation8 + $0x10] sm:$0xff]   ;;  %v1476_v15 = vld [vmem:[#allocation8 + $0x18] sm:$0xff]   ;;  %s994_s26 = sshll.u32 %s536_s25, 4  ;;  %s979_s11 = scalar_lea.sflag [#allocation4], %s2296_s1  ;;  %s2361_s26 = int_to_ptr.vmem [resolvable:$true] %s994_s26 }
 0x14a   : > { %1265 = vmatpush3.bf16.msra.mxu1 %v1473_v10  ;;  %v1466_v12 = vld [vmem:[#allocation5 + $0x28] sm:$0xff]   ;;  %v1467_v14 = vld [vmem:[#allocation5 + $0x30] sm:$0xff]   ;;  %v1468_v16 = vld [vmem:[#allocation5 + $0x38] sm:$0xff]   ;;  %s1777_s4 = scalar_lea.vmem %s2361_s26, 256  ;;  %p2462_p5 = scmp.ne.s32.totalorder %s2451_s30, 0 }
 0x14b   : > { %1217 = vmatprep.mubr.msk.bf16.mxu0 %vm649_vm0, %v545_v9  ;;  %1266 = vmatprep.subr.bf16.mxu1 %v1896_v1  ;;  %v1477_v17 = vld [vmem:[#allocation8 + $0x20] sm:$0xff]   ;;  %v1478_v19 = vld [vmem:[#allocation8 + $0x28] sm:$0xff]   ;;  %v1472_v22 = vld [vmem:[#allocation5 + $0x58] sm:$0xff]   ;;  %p1778_p1 = scmp.ne.s32.totalorder %s2361_s26, %s1777_s4  ;;  %s1898_s29 = smov [#allocation19]  }
 0x14c   : > { %656 = vmatpush1.bf16.msra.mxu0 %v1462_v3  ;;  %v1469_v18 = vld [vmem:[#allocation5 + $0x40] sm:$0xff]   ;;  %v1470_v20 = vld [vmem:[#allocation5 + $0x48] sm:$0xff]   ;;  %v1471_v21 = vld [vmem:[#allocation5 + $0x50] sm:$0xff]   ;;  %s1781_s19 = sshll.u32 %s1898_s29, 4  ;;  %s1782_s19 = int_to_ptr.vmem [resolvable:$false] %s1781_s19 }
 0x14d   : > { %657 = vmatprep.subr.bf16.mxu0 %v1895_v0  ;;  %v540_v23 = vld [vmem:[%s2300_s16] sm:$0xff]  ;;  %v542_v24 = vld [vmem:[%s2300_s16 + $0x10] sm:$0xff]  ;;  %s1245_s24 = sshll.u32 %s2460_s20, 8  ;;  %p1779_p8 = pnand %p1778_p1, %p2462_p5 }
 0x14e   : > { %1267 = vmatpush3.bf16.msra.mxu1 %v1474_v11  ;;  %v544_v25 = vpack.c.bf16 %v542_v24, %v540_v23  ;;  %v1479_v26 = vld [vmem:[#allocation8 + $0x30] sm:$0xff]   ;;  %v1480_v27 = vld [vmem:[#allocation8 + $0x38] sm:$0xff]   ;;  %v1481_v37 = vld [vmem:[#allocation11] sm:$0xff]   ;;  %s2359_s22 = scalar_lea.hbm %s2461_s27, %s1245_s24  ;;  %s1783_s16 = scalar_lea.vmem %s1782_s19, 512 }
 0x14f   : > { %1268 = vmatprep.subr.bf16.mxu1 %v1896_v1  ;;  %v1204_v28 = vld [vmem:[#allocation7] ss:$0 sm:$0xff]  ;;  %v1482_v39 = vld [vmem:[#allocation11 + $0x8] sm:$0xff]   ;;  %v1483_v40 = vld [vmem:[#allocation11 + $0x10] sm:$0xff]   ;;  %p1780_p3 = pneg %p1779_p8  ;;  %p1784_p11 = scmp.lt.s32.totalorder %s2361_s26, %s1782_s19 }
 0x150   : > { %658 = vmatpush1.bf16.msra.mxu0 %v1463_v4  ;;  %v1484_v41 = vld [vmem:[#allocation11 + $0x18] sm:$0xff]   ;;  %v1485_v42 = vld [vmem:[#allocation11 + $0x20] sm:$0xff]   ;;  %v1486_v43 = vld [vmem:[#allocation11 + $0x28] sm:$0xff]   ;;  %p1785_p6 = scmp.lt.s32.totalorder %s1783_s16, %s1777_s4 }
 0x151   : > { %659 = vmatprep.subr.bf16.mxu0 %v1895_v0  ;;  %v1487_v44 = vld [vmem:[#allocation11 + $0x30] sm:$0xff]   ;;  %v1488_v45 = vld [vmem:[#allocation11 + $0x38] sm:$0xff]   ;;  %v1227_v56 = vld [vmem:[#allocation13] ss:$0 sm:$0xff] }
 0x152   : > { %1269 = vmatpush3.bf16.msra.mxu1 %v1475_v13  ;;  %v1218_v46 = vld [vmem:[#allocation10] ss:$0 sm:$0xff]  ;;  %p1786_p13 = por %p1785_p6, %p1784_p11 }
 0x153   : > { %1270 = vmatprep.subr.bf16.mxu1 %v1896_v1 }
 0x154   : > { %660 = vmatpush1.bf16.msra.mxu0 %v1464_v5  ;;  %p1787_p4 = pnand %p1786_p13, %p1780_p3 }
 0x155   : > { %661 = vmatprep.subr.bf16.mxu0 %v1895_v0 }
 0x156   : > { %1271 = vmatpush3.bf16.msra.mxu1 %v1476_v15 }
 0x157   : > { %1272 = vmatprep.subr.bf16.mxu1 %v1896_v1 }
 0x158   : > { %662 = vmatpush1.bf16.msra.mxu0 %v1465_v8 }
 0x159   : > { %663 = vmatprep.subr.bf16.mxu0 %v1895_v0 }
 0x15a   : > { %1273 = vmatpush3.bf16.msra.mxu1 %v1477_v17 }
 0x15b   : > { %1274 = vmatprep.subr.bf16.mxu1 %v1896_v1 }
 0x15c   : > { %664 = vmatpush1.bf16.msra.mxu0 %v1466_v12 }
 0x15d   : > { %665 = vmatprep.subr.bf16.mxu0 %v1895_v0 }
 0x15e   : > { %1275 = vmatpush3.bf16.msra.mxu1 %v1478_v19 }
 0x15f   : > { %1276 = vmatprep.subr.bf16.mxu1 %v1896_v1 }
 0x160   : > { %666 = vmatpush1.bf16.msra.mxu0 %v1467_v14  ;;  %v1236_v14 = vld [vmem:[#allocation14] ss:$0 sm:$0xff] }
 0x161   : > { %667 = vmatprep.subr.bf16.mxu0 %v1895_v0 }
 0x162   : > { %1277 = vmatpush3.bf16.msra.mxu1 %v1479_v26 }
 0x163   : > { %1278 = vmatprep.subr.bf16.mxu1 %v1896_v1 }
 0x164   : > { %668 = vmatpush1.bf16.msra.mxu0 %v1468_v16  ;;  %v1237_v16 = vld [vmem:[#allocation16] ss:$0 sm:$0xff] }
 0x165   : > { %669 = vmatprep.subr.bf16.mxu0 %v1895_v0 }
 0x166   : > { %1279 = vmatpush3.bf16.msra.mxu1 %v1480_v27 }
 0x167   : > { %1284 = vmatprep.subr.bf16.mxu1 %v1896_v1 }
 0x168   : > { %670 = vmatpush1.bf16.msra.mxu0 %v1469_v18 }
 0x169   : > { %671 = vmatprep.subr.bf16.mxu0 %v1895_v0 }
 0x16c   : > { %672 = vmatpush1.bf16.msra.mxu0 %v1470_v20 }
 0x16d   : > { %673 = vmatprep.subr.bf16.mxu0 %v1895_v0 }
 0x170   : > { %674 = vmatpush1.bf16.msra.mxu0 %v1471_v21  ;;  %v1238_v21 = vld [vmem:[%s496_s3] ss:$0 sm:$0xff] }
 0x171   : > { %675 = vmatprep.subr.bf16.mxu0 %v1895_v0 }
 0x174   : > { %676 = vmatpush1.bf16.msra.mxu0 %v1472_v22 }
 0x177   : > { %686 = vmatmul.mubr.bf16.vlgmr.msra.gmra.mrb[0].mxu0 %v544_v25 }
 0x24a   : > { %v687_v29 = vpop.f32.mrb[0].mxu0 }
 0x24b   : > { %v688_v30 = vadd.f32 %v1204_v28, %v687_v29  ;;  %v689_v31 = vpop.f32.mrb[1].mxu0 }
 0x24c   : > { %v690_v32 = vpop.f32.mrb[2].mxu0 }
 0x24d   : > { %v691_v33 = vadd.f32 %v1204_v28, %v690_v32  ;;  %v692_v34 = vpop.f32.mrb[3].mxu0  ;;  %v694_v35 = vmax.f32 %v688_v30, 0.0 }
 0x24f   : > { %v695_v36 = vmax.f32 %v691_v33, 0.0 }
 0x251   : > { %v696_v38 = vpack.c.bf16 %v695_v36, %v694_v35 }
 0x253   : > { %1281 = vmatmul.mubr.bf16.vlgmr.msra.gmra.mrb[0].mxu1 %v696_v38 }
 0x254   : > { %1285 = vmatpush3.bf16.msra.mxu1 %v1481_v37  ;;  %1300 = vmatprep.mubr.msk.bf16.mxu1 %vm1897_vm1, %v1896_v1 }
 0x255   : > { %1286 = vmatprep.subr.bf16.mxu1 %v1896_v1 }
 0x258   : > { %1287 = vmatpush3.bf16.msra.mxu1 %v1482_v39 }
 0x259   : > { %1288 = vmatprep.subr.bf16.mxu1 %v1896_v1 }
 0x25c   : > { %1289 = vmatpush3.bf16.msra.mxu1 %v1483_v40 }
 0x25d   : > { %1290 = vmatprep.subr.bf16.mxu1 %v1896_v1 }
 0x260   : > { %1291 = vmatpush3.bf16.msra.mxu1 %v1484_v41 }
 0x261   : > { %1292 = vmatprep.subr.bf16.mxu1 %v1896_v1 }
 0x264   : > { %1293 = vmatpush3.bf16.msra.mxu1 %v1485_v42 }
 0x265   : > { %1294 = vmatprep.subr.bf16.mxu1 %v1896_v1 }
 0x268   : > { %1295 = vmatpush3.bf16.msra.mxu1 %v1486_v43 }
 0x269   : > { %1296 = vmatprep.subr.bf16.mxu1 %v1896_v1 }
 0x26c   : > { %1297 = vmatpush3.bf16.msra.mxu1 %v1487_v44 }
 0x26d   : > { %1298 = vmatprep.subr.bf16.mxu1 %v1896_v1 }
 0x270   : > { %1299 = vmatpush3.bf16.msra.mxu1 %v1488_v45 }
 0x326   : > { %v802_v47 = vpop.f32.mrb[0].mxu1 }
 0x327   : > { %v803_v48 = vadd.f32 %v1218_v46, %v802_v47  ;;  %v1282_v49 = vpop.f32.mrb[1].mxu1 }
 0x328   : > { %v805_v50 = vpop.f32.mrb[2].mxu1 }
 0x329   : > { %v806_v51 = vadd.f32 %v1218_v46, %v805_v50  ;;  %v1283_v52 = vpop.f32.mrb[3].mxu1  ;;  %v809_v53 = vmax.f32 %v803_v48, 0.0 }
 0x32b   : > { %v810_v54 = vmax.f32 %v806_v51, 0.0 }
 0x32d   : > { %v811_v55 = vpack.c.bf16 %v810_v54, %v809_v53 }
 0x32f   : > { %1301 = vmatmul.mubr.bf16.vlgmr.msra.gmra.mrb[4].mxu1 %v811_v55 }
 0x402   : > { %v917_v57 = vpop.f32.mrb[4].mxu1 }
 0x403   : > { %v918_v58 = vadd.f32 %v1227_v56, %v917_v57  ;;  %v1302_v59 = vpop.f32.mrb[5].mxu1 }
 0x404   : > { %v920_v60 = vpop.f32.mrb[6].mxu1 }
 0x405   : > { %926 = vadd.xlane.f32.xlu0 %v918_v58  ;;  %v1303_v61 = vpop.f32.mrb[7].mxu1  ;;  %v921_v62 = vadd.f32 %v1227_v56, %v920_v60 }
 0x409   : > { %928 = vadd.xlane.f32.xlu0 %v921_v62 }
 0x492   : > { %v927_v63 = vpop.xlane.xlu0 %926 }
 0x493   : > { %v931_v0 = vmul.f32 0.0078125, %v927_v63 }
 0x495   : > { %v933_v1 = vsub.f32 %v918_v58, %v931_v0 }
 0x496   : > { %v929_v2 = vpop.xlane.xlu0 %928 }
 0x497   : > { %v932_v3 = vmul.f32 0.0078125, %v929_v2  ;;  %v935_v4 = vmul.f32 %v933_v1, %v933_v1 }
 0x499   : > { %v934_v5 = vsub.f32 %v921_v62, %v932_v3  ;;  %937 = vadd.xlane.f32.xlu1 %v935_v4 }
 0x49b   : > { %v936_v6 = vmul.f32 %v934_v5, %v934_v5 }
 0x49d   : > { %939 = vadd.xlane.f32.xlu1 %v936_v6 }
 0x526   : > { %v938_v7 = vpop.xlane.xlu1 %937 }
 0x527   : > { %v941_v8 = vmul.f32 0.0078125, %v938_v7 }
 0x529   : > { %v943_v9 = vadd.f32 1e-05, %v941_v8 }
 0x52a   : > { %v940_v10 = vpop.xlane.xlu1 %939 }
 0x52b   : > { %1489 = vrsqrt.f32 %v943_v9  ;;  %v942_v11 = vmul.f32 0.0078125, %v940_v10 }
 0x52d   : > { %v944_v12 = vadd.f32 1e-05, %v942_v11 }
 0x52f   : > { %1491 = vrsqrt.f32 %v944_v12 }
 0x535   : > { %v1490_v13 = vpop.eup %1489 }
 0x536   : > { %v947_v15 = vmul.f32 %v1490_v13, %v933_v1 }
 0x538   : > { %v955_v17 = vmul.f32 %v1236_v14, %v947_v15 }
 0x539   : > { %v1492_v18 = vpop.eup %1491 }
 0x53a   : > { %v963_v19 = vadd.f32 %v1237_v16, %v955_v17  ;;  %v948_v20 = vmul.f32 %v1492_v18, %v934_v5 }
 0x53c   : > { %v965_v22 = vmax.f32 %v963_v19, 0.0  ;;  %v956_v23 = vmul.f32 %v1236_v14, %v948_v20 }
 0x53e   : > { %v974_v24 = vadd.f32 %v1238_v21, %v965_v22  ;;  %v964_v25 = vadd.f32 %v1237_v16, %v956_v23 }
 0x540   : > { %v966_v26 = vmax.f32 %v964_v25, 0.0  ;;  %976 = vst [vmem:[%s536_s25] sm:$0xff] %v974_v24 }
 0x542   : > { %v975_v27 = vadd.f32 %v1238_v21, %v966_v26 }
 0x544   : > { %977 = vst [vmem:[%s536_s25 + $0x8] sm:$0xff] %v975_v27 }
 0x545   : > { %1790 = shalt.err (!%p1787_p4)
}
 0x546   : > { %s1791_s2 = scalar_lea.hbm %s2359_s22, 256  ;;  %s1795_s28 = scalar_lea.hbm %s2461_s27, 512 }
 0x547   : > { %p1792_p9 = scmp.ne.s32.totalorder %s2359_s22, %s1791_s2  ;;  %p1796_p12 = scmp.lt.u32.totalorder %s2359_s22, %s2461_s27 }
 0x548   : > { %p1797_p2 = scmp.lt.u32.totalorder %s1795_s28, %s1791_s2  ;;  %p1799_p1 = scmp.lt.u32.totalorder %s1791_s2, %s2359_s22 }
 0x549   : > { %p1793_p0 = pnand %p1792_p9, %p2462_p5 }
 0x54a   : > { %p1798_p10 = por %p1797_p2, %p1796_p12 }
 0x54b   : > { %p1794_p7 = pneg %p1793_p0 }
 0x54c   : > { %p1800_p8 = por %p1799_p1, %p1798_p10 }
 0x54e   : > { %p1801_p3 = pnand %p1800_p8, %p1794_p7 }
 0x550   : > { %1804 = shalt.err (!%p1801_p3)
}
 0x551   : > { %s1899_s12 = smov 128   ;;  %s1900_s21 = smov 8  }
 0x552   : > { %1340 = dma.vmem_to_hbm [thread:$0]  (%p2462_p5), %s2361_s26, 256, %s2359_s22, %s979_s11, %s1899_s12, %s1899_s12, %s1900_s21  }
 0x553 PF: > { %s1009_s4 = sand.u32 1, %s1859_s13   ;;  %p2463_p11 = scmp.ne.s32.totalorder %s2452_s10, 0 }
 0x554   : > { %p2464_p6 = scmp.ge.s32.totalorder %s1879_s18, 2  ;;  %s1010_s29 = scalar_lea.sflag [#allocation4], %s1009_s4 }
 0x556   : > { %p1375_p13 = pnand %p2464_p6, %p2463_p11 }
 0x558   : > { %1854 = dma.done.wait (!%p1375_p13), %s1010_s29, 256  }
 0x559   : > { %1856 = vsyncadd (!%p1375_p13), %s1010_s29, 4294967040  ;;  %s33_s18 = sadd.s32 1, %s1879_s18   ;;  %s2465_s13 = smov %s1863_s14 }
 0x55a   : > { %p30_p4 = scmp.ge.s32.totalorder %s33_s18, 4   ;;  %s2466_s14 = smov %s1867_s15 }
 0x55b   : > { %s2467_s15 = smov %s2213_s9  ;;  %s2468_s16 = smov %s1875_s17 }
 0x55c   : > { %s2469_s17 = smov %s2471_s23  ;;  %32 = sbr.rel (!%p30_p4) target bundleno = 20 (0x14), region = 150 }
 0x563   :  { %1015 = vsyncpa [#allocation3], 1 }
 0x564   :  { %1017 = vsyncpa [#allocation3 + $0x1], 1 }
 0x565   :  { %1018 = vsyncpa [#allocation6], 1 }
 0x566   :  { %1019 = vsyncpa [#allocation9], 1 }
 0x567   :  { %1020 = vsyncpa [#allocation12], 1 }
 0x568   :  { %1021 = vsyncpa [#allocation15], 1 }
 0x569   :  { %1022 = vsyncpa [#allocation18], 1 }
 0x56a   :  { %1024 = vsyncpa [#allocation18 + $0x1], 1 }
 0x56b   :  { %1025 = vsyncpa [#allocation4], 1 }
 0x56c   :  { %1027 = vsyncpa [#allocation4 + $0x1], 1 }

</bundles_post_ra>
